<compile_context>
chip_gen: v7x
topology: tpu7x:2x2x1
jax: 0.10.0
libtpu: 0.0.40
codegen_flags: <defaults>
</compile_context>

<pallas_src>
import functools

import jax
import jax.numpy as jnp
from jax import lax
from jax.experimental import pallas as pl
from jax.experimental.pallas import tpu as pltpu

_LANE = 128


def _loss_kernel(x_ref, t_ref, o_ref, *, rows, block_rows, blocks_per_split,
                 need_mask):
    # o_ref is the (1, 1, 128) lane-wise partial-sum accumulator for this
    # split; it stays resident in VMEM across the whole reduction axis.
    @pl.when(pl.program_id(1) == 0)
    def _():
        o_ref[...] = jnp.zeros_like(o_ref)

    # Stream tiles in native dtype; upcast on the VPU (free: kernel is
    # HBM-bound and the VPU has large slack).
    x = x_ref[...].astype(jnp.float32)
    t = t_ref[...].astype(jnp.float32)
    v = (1.0 - 2.0 * t) * x

    if need_mask:
        # Zero out rows beyond the true row count: the ragged last block and
        # (when the block count is odd) the redundant clamped block of the
        # last split.
        row_base = (pl.program_id(0) * blocks_per_split
                    + pl.program_id(1)) * block_rows
        rid = row_base + lax.broadcasted_iota(jnp.int32, v.shape, 0)
        v = jnp.where(rid < rows, v, 0.0)

    # Keep 128 lane-wise partial sums; only a tiny final reduce happens
    # outside the kernel.
    psum = jnp.sum(v, axis=0, keepdims=True).reshape(1, 1, _LANE)
    o_ref[...] += psum


def y_logits_binary_class_loss(inputs, targets, *, block_rows=2048,
                               num_splits=2):
    """Pallas TPU equivalent of torch.mean((1 - 2*targets) * inputs)."""
    assert inputs.shape == targets.shape
    n = inputs.size
    assert n > 0

    x = inputs.reshape(-1)
    t = targets.reshape(-1)

    # Minimal lane padding only when n is not a multiple of 128. Zero padding
    # is exact for this loss: (1 - 2*0) * 0 == 0.
    # TODO(synk): handle a non-multiple-of-128 tail fully in-kernel to avoid
    # this (rare-case) HBM copy as well.
    lane_pad = (-n) % _LANE
    if lane_pad:
        x = jnp.pad(x, (0, lane_pad))
        t = jnp.pad(t, (0, lane_pad))

    rows = x.size // _LANE
    x2 = x.reshape(rows, _LANE)
    t2 = t.reshape(rows, _LANE)

    # Sublane alignment for the block's second-to-last dim:
    # 8 for 32-bit, 16 for 16-bit, 32 for 8-bit element types.
    def _align(dt):
        return max(8, 32 // jnp.dtype(dt).itemsize)

    align = max(_align(x2.dtype), _align(t2.dtype))

    # Largest useful block: big for streaming efficiency, but never (much)
    # larger than the array itself for small inputs.
    br = min(block_rows, pl.cdiv(rows, align) * align)
    br = pl.cdiv(br, align) * align

    nblocks = pl.cdiv(rows, br)                 # total row-blocks of work
    gm = pl.cdiv(nblocks, num_splits)           # reduction steps per split
    last_block = nblocks - 1
    need_mask = (num_splits * gm * br) != rows  # any out-of-range rows?

    def in_map(c, i):
        # Clamp so a redundant trailing block of the last split maps to a
        # valid block; its contribution is masked to zero in-kernel.
        return (jnp.minimum(c * gm + i, last_block), 0)

    kernel = functools.partial(
        _loss_kernel,
        rows=rows, block_rows=br, blocks_per_split=gm, need_mask=need_mask)

    partials = pl.pallas_call(
        kernel,
        out_shape=jax.ShapeDtypeStruct((num_splits, 1, _LANE), jnp.float32),
        grid=(num_splits, gm),
        in_specs=[
            pl.BlockSpec((br, _LANE), in_map),
            pl.BlockSpec((br, _LANE), in_map),
        ],
        out_specs=pl.BlockSpec((1, 1, _LANE), lambda c, i: (c, 0, 0)),
        compiler_params=pltpu.CompilerParams(
            dimension_semantics=("parallel", "arbitrary"),
            vmem_limit_bytes=32 * 1024 * 1024,
        ),
    )(x2, t2)

    # Final tiny cross-lane / cross-split reduce + 1/N scale (done in plain
    # JAX on a (num_splits, 1, 128) array; negligible).
    return jnp.sum(partials) / n


if __name__ == "__main__":
    key = jax.random.PRNGKey(0)
    k_x, k_t = jax.random.split(key)

    # Small NCHW-like logits/targets pair.
    shape = (2, 4, 16, 16)
    inputs = jax.random.normal(k_x, shape, dtype=jnp.float32)
    # 0/1 labels streamed as bf16 (exact, half the HBM bytes of f32); the
    # kernel upcasts in-VMEM — no wrapper-side casts.
    targets = jax.random.bernoulli(k_t, p=0.5, shape=shape).astype(jnp.bfloat16)

    loss = y_logits_binary_class_loss(inputs, targets)
    loss = jax.block_until_ready(loss)

    # Reference check (plain JAX, f32 math).
    ref = jnp.mean((1.0 - 2.0 * targets.astype(jnp.float32)) * inputs)
    assert jnp.allclose(loss, ref, atol=1e-6, rtol=1e-5), (loss, ref)

    print("KERNEL_OK")
</pallas_src>

<mosaic_0001>
module attributes {stable_mosaic.version = 11 : i64} {
  func.func @_loss_kernel(%arg0: i32, %arg1: i32, %arg2: memref<16x128xf32, #tpu.memory_space<vmem>>, %arg3: memref<16x128xbf16, #tpu.memory_space<vmem>>, %arg4: memref<1x1x128xf32, #tpu.memory_space<vmem>>) attributes {dimension_semantics = [#tpu.dimension_semantics<parallel>, #tpu.dimension_semantics<arbitrary>], iteration_bounds = array<i64: 2, 1>, scalar_prefetch = 0 : i64, scratch_operands = 0 : i64, tpu.core_type = #tpu.core_type<tc>, window_params = [{transform_indices = @transform_0, window_bounds = array<i64: 16, 128>}, {transform_indices = @transform_1, window_bounds = array<i64: 16, 128>}, {transform_indices = @transform_2, window_bounds = array<i64: 1, 1, 128>}]} {
    %c0_i32 = arith.constant 0 : i32
    %0 = arith.cmpi eq, %arg1, %c0_i32 : i32
    %1 = arith.extui %0 : i1 to i32
    %c0_i32_0 = arith.constant 0 : i32
    %2 = arith.cmpi ne, %1, %c0_i32_0 : i32
    scf.if %2 {
      %cst_14 = arith.constant 0.000000e+00 : f32
      %27 = vector.broadcast %cst_14 : f32 to vector<1x1x128xf32>
      %c0_15 = arith.constant 0 : index
      %c0_16 = arith.constant 0 : index
      %c0_17 = arith.constant 0 : index
      %28 = vector.load %arg4[%c0_15, %c0_16, %c0_17] : memref<1x1x128xf32, #tpu.memory_space<vmem>>, vector<1x1x128xf32>
      tpu.vector_store %arg4[%c0_15, %c0_16, %c0_17], %27 {strides = array<i32>} : memref<1x1x128xf32, #tpu.memory_space<vmem>>, vector<1x1x128xf32>,
    } else {
    }
    %c0 = arith.constant 0 : index
    %c0_1 = arith.constant 0 : index
    %3 = vector.load %arg2[%c0, %c0_1] : memref<16x128xf32, #tpu.memory_space<vmem>>, vector<16x128xf32>
    %c0_2 = arith.constant 0 : index
    %c0_3 = arith.constant 0 : index
    %4 = vector.load %arg3[%c0_2, %c0_3] : memref<16x128xbf16, #tpu.memory_space<vmem>>, vector<16x128xbf16>
    %5 = arith.extf %4 : vector<16x128xbf16> to vector<16x128xf32>
    %cst = arith.constant 2.000000e+00 : f32
    %6 = vector.broadcast %cst : f32 to vector<16x128xf32>
    %7 = arith.mulf %6, %5 : vector<16x128xf32>
    %cst_4 = arith.constant 1.000000e+00 : f32
    %8 = vector.broadcast %cst_4 : f32 to vector<16x128xf32>
    %9 = arith.subf %8, %7 : vector<16x128xf32>
    %10 = arith.mulf %9, %3 : vector<16x128xf32>
    %c1_i32 = arith.constant 1 : i32
    %11 = arith.muli %arg0, %c1_i32 : i32
    %12 = arith.addi %11, %arg1 : i32
    %c16_i32 = arith.constant 16 : i32
    %13 = arith.muli %12, %c16_i32 : i32
    %14 = tpu.iota {dimensions = array<i32: 0>} : vector<16x128xi32>
    %15 = vector.broadcast %13 : i32 to vector<16x128xi32>
    %16 = arith.addi %15, %14 : vector<16x128xi32>
    %c16_i32_5 = arith.constant 16 : i32
    %17 = vector.broadcast %c16_i32_5 : i32 to vector<16x128xi32>
    %18 = arith.cmpi slt, %16, %17 : vector<16x128xi32>
    %cst_6 = arith.constant 0.000000e+00 : f32
    %19 = vector.broadcast %cst_6 : f32 to vector<16x128xf32>
    %20 = arith.select %18, %10, %19 : vector<16x128xi1>, vector<16x128xf32>
    %cst_7 = arith.constant dense<0.000000e+00> : vector<128xf32>
    %21 = vector.multi_reduction <add>, %20, %cst_7 [0] : vector<16x128xf32> to vector<128xf32>
    %22 = vector.shape_cast %21 : vector<128xf32> to vector<1x128xf32>
    %23 = vector.shape_cast %22 : vector<1x128xf32> to vector<1x1x128xf32>
    %c0_8 = arith.constant 0 : index
    %c0_9 = arith.constant 0 : index
    %c0_10 = arith.constant 0 : index
    %24 = vector.load %arg4[%c0_8, %c0_9, %c0_10] : memref<1x1x128xf32, #tpu.memory_space<vmem>>, vector<1x1x128xf32>
    %25 = arith.addf %24, %23 : vector<1x1x128xf32>
    %c0_11 = arith.constant 0 : index
    %c0_12 = arith.constant 0 : index
    %c0_13 = arith.constant 0 : index
    %26 = vector.load %arg4[%c0_11, %c0_12, %c0_13] : memref<1x1x128xf32, #tpu.memory_space<vmem>>, vector<1x1x128xf32>
    tpu.vector_store %arg4[%c0_11, %c0_12, %c0_13], %25 {strides = array<i32>} : memref<1x1x128xf32, #tpu.memory_space<vmem>>, vector<1x1x128xf32>,
    return
  }
  func.func @transform_0(%arg0: i32, %arg1: i32) -> (i32, i32) {
    %c1_i32 = arith.constant 1 : i32
    %0 = arith.muli %arg0, %c1_i32 : i32
    %1 = arith.addi %0, %arg1 : i32
    %c0_i32 = arith.constant 0 : i32
    %2 = arith.minsi %1, %c0_i32 : i32
    %c0_i32_0 = arith.constant 0 : i32
    %c0_i32_1 = arith.constant 0 : i32
    return %2, %c0_i32_0 : i32, i32
  }
  func.func @transform_1(%arg0: i32, %arg1: i32) -> (i32, i32) {
    %c1_i32 = arith.constant 1 : i32
    %0 = arith.muli %arg0, %c1_i32 : i32
    %1 = arith.addi %0, %arg1 : i32
    %c0_i32 = arith.constant 0 : i32
    %2 = arith.minsi %1, %c0_i32 : i32
    %c0_i32_0 = arith.constant 0 : i32
    %c0_i32_1 = arith.constant 0 : i32
    return %2, %c0_i32_0 : i32, i32
  }
  func.func @transform_2(%arg0: i32, %arg1: i32) -> (i32, i32, i32) {
    %c0_i32 = arith.constant 0 : i32
    %c0_i32_0 = arith.constant 0 : i32
    %c0_i32_1 = arith.constant 0 : i32
    return %arg0, %c0_i32, %c0_i32_0 : i32, i32, i32
  }
}

</mosaic_0001>

<bundles_post_ra>
// kernel: tpu_custom_call.1
= control target key start
LH: loop header
LB: loop body
LE: loop exit
PB: predicated region body
PF: predicated region fallthrough
CT: control target
= control target key end

     0   :  { %7 = vsyncpa [#allocation3], 0  ;;  %s910_s0 = inlined_call_operand.hbm [shape: f32[16,128], index: 0, kind: input, shape index: {}]   ;;  %s911_s1 = inlined_call_operand.hbm [shape: bf16[16,128], index: 1, kind: input, shape index: {}]   ;;  %s912_s2 = inlined_call_operand.hbm [shape: f32[2,1,128], index: 2, kind: output, shape index: {}]  }
   0x1   :  { %9 = vsyncpa [#allocation3 + $0x1], 0 }
   0x2   :  { %10 = vsyncpa [#allocation6], 0 }
   0x3   :  { %12 = vsyncpa [#allocation6 + $0x1], 0 }
   0x4   :  { %13 = vsyncpa [#allocation4], 0 }
   0x5   :  { %15 = vsyncpa [#allocation4 + $0x1], 0  ;;  %s699_s9 = smov 0   ;;  %s701_s10 = smov 0  }
   0x6   :  { %s703_s11 = smov 0   ;;  %s705_s12 = smov 0  }
   0x7   :  { %s707_s13 = smov 0   ;;  %s709_s14 = smov 0  }
   0x8   :  { %s711_s15 = smov 0   ;;  %s713_s16 = smov 0  }
   0x9 LB: > { %s388_s17 = sadd.s32 4294967295, %s674_s16   ;;  %s389_s18 = sadd.s32 4294967294, %s674_s16   ;;  %s674_s16 = sphi %s713_s16, %s21_s16   ;;  %s670_s15 = sphi %s711_s15, %s931_s15   ;;  %s666_s14 = sphi %s709_s14, %s930_s14   ;;  %s662_s13 = sphi %s707_s13, %s900_s13   ;;  %s658_s12 = sphi %s705_s12, %s929_s12   ;;  %s654_s11 = sphi %s703_s11, %s928_s11   ;;  %s650_s10 = sphi %s701_s10, %s927_s10   ;;  %s646_s9 = sphi %s699_s9, %s926_s9  }
   0xa   : > { %s33_s19 = sadd.s32 1, %s670_s15  ;;  %p643_p1 = scmp.ne.s32.totalorder %s662_s13, 0 }
   0xb   : > { %p35_p0 = scmp.ge.s32.totalorder %s33_s19, 2  ;;  %p54_p2 = scmp.eq.s32.totalorder %s674_s16, 0 }
   0xc   : > { %p59_p3 = scmp.ne.s32.totalorder %s662_s13, %s658_s12  ;;  %p60_p5 = scmp.eq.s32.totalorder %s388_s17, 0 }
   0xd   : > { %s933_s19 = smov (%p35_p0, %s33_s19), 0  ;;  %p745_p4 = por %p643_p1, %p54_p2 }
   0xe   : > { %p749_p6 = por %p60_p5, %p59_p3  ;;  %s101_s22 = ssub.s32 %s670_s15, %s933_s19 }
   0xf   : > { %p102_p7 = scmp.eq.s32.totalorder %s101_s22, 0  ;;  %s104_s23 = sadd.s32 1, %s654_s11 }
  0x10   : > { %s916_s21 = scalar_select %p749_p6, 1, 0 }
  0x11   : > { %s757_s24 = scalar_select %p102_p7, %s654_s11, %s104_s23  }
  0x12   : > { %p114_p8 = scmp.ne.s32.totalorder %s654_s11, %s650_s10  ;;  %p115_p9 = scmp.eq.s32.totalorder %s388_s17, 1 }
  0x13   : > { %p120_p10 = scmp.ne.s32.totalorder %s650_s10, %s646_s9  ;;  %p121_p11 = scmp.eq.s32.totalorder %s389_s18, 1 }
  0x14   : > { %p763_p12 = por %p115_p9, %p114_p8  ;;  %p428_p1 = scmp.lt.s32.totalorder %s674_s16, 2 }
  0x15   : > { %p768_p0 = por %p121_p11, %p120_p10  ;;  %s676_s27 = smov [#allocation2]  }
  0x16   : > { %s917_s25 = scalar_select %p763_p12, 1, 0 }
  0x17   : > { %s918_s26 = scalar_select %p768_p0, 1, 0 }
  0x18   : > { %s155_s28 = sshll.u32 %s676_s27, 4  ;;  %p775_p2 = pnand %p428_p1, %p745_p4  ;;  %s156_s28 = int_to_ptr.vmem [resolvable:$true] %s155_s28 }
  0x19   : > { %s507_s4 = scalar_lea.hbm %s910_s0, 256 }
  0x1a   : > { %p508_p3 = scmp.ne.s32.totalorder %s910_s0, %s507_s4  ;;  %p509_p5 = pneg %p775_p2 }
  0x1b   : > { %p514_p8 = scmp.lt.u32.totalorder %s507_s4, %s507_s4  ;;  %p516_p9 = scmp.lt.u32.totalorder %s507_s4, %s910_s0 }
  0x1c   : > { %p510_p7 = pnand %p509_p5, %p508_p3 }
  0x1d   : > { %p517_p10 = por %p516_p9, %p514_p8 }
  0x1e   : > { %p511_p4 = pneg %p510_p7 }
  0x20   : > { %p518_p11 = pnand %p517_p10, %p511_p4 }
  0x22   : > { %521 = shalt.err (!%p518_p11)
}
  0x23   : > { %s522_s12 = scalar_lea.vmem %s156_s28, 256  ;;  %s529_s17 = scalar_lea.vmem %s156_s28, 512 }
  0x24   : > { %p523_p1 = scmp.ne.s32.totalorder %s156_s28, %s522_s12  ;;  %p530_p12 = scmp.lt.s32.totalorder %s156_s28, %s156_s28 }
  0x25   : > { %p531_p6 = scmp.lt.s32.totalorder %s529_s17, %s522_s12 }
  0x26   : > { %p525_p13 = pnand %p523_p1, %p509_p5 }
  0x27   : > { %p532_p3 = por %p531_p6, %p530_p12 }
  0x28   : > { %p526_p0 = pneg %p525_p13 }
  0x2a   : > { %p533_p7 = pnand %p532_p3, %p526_p0 }
  0x2c   : > { %536 = shalt.err (!%p533_p7)
}
  0x2d   : > { %s677_s18 = smov 128   ;;  %s678_s20 = smov 8  }
  0x2e   : > { %420 = dma.hbm_to_vmem [thread:$0]  (!%p775_p2), %s910_s0, 256, %s156_s28, [#allocation3], %s677_s18, %s677_s18, %s678_s20  }
  0x2f   : > { %p398_p4 = scmp.ge.s32.totalorder %s674_s16, 1  ;;  %p187_p8 = scmp.lt.s32.totalorder %s674_s16, 3 }
  0x30   : > { %s679_s30 = smov [#allocation5]   ;;  %s537_s6 = scalar_lea.hbm %s911_s1, 128 }
  0x31   : > { %p803_p13 = pnand %p398_p4, %p187_p8  ;;  %s179_s3 = sshll.u32 %s679_s30, 4  ;;  %s180_s3 = int_to_ptr.vmem [resolvable:$true] %s179_s3 }
  0x32   : > { %p538_p6 = scmp.ne.s32.totalorder %s911_s1, %s537_s6  ;;  %p544_p9 = scmp.lt.u32.totalorder %s537_s6, %s537_s6 }
  0x33   : > { %s920_s27 = scalar_select %p803_p13, 1, 0 }
  0x34   : > { %p540_p12 = pnand %p538_p6, %p509_p5  ;;  %p546_p10 = scmp.lt.u32.totalorder %s537_s6, %s911_s1 }
  0x36   : > { %p541_p0 = pneg %p540_p12  ;;  %p547_p11 = por %p546_p10, %p544_p9 }
  0x38   : > { %p548_p1 = pnand %p547_p11, %p541_p0 }
  0x3a   : > { %551 = shalt.err (!%p548_p1)
}
  0x3b   : > { %s552_s17 = scalar_lea.vmem %s180_s3, 128  ;;  %s559_s18 = scalar_lea.vmem %s180_s3, 256 }
  0x3c   : > { %p553_p3 = scmp.ne.s32.totalorder %s180_s3, %s552_s17  ;;  %p560_p8 = scmp.lt.s32.totalorder %s180_s3, %s180_s3 }
  0x3d   : > { %p561_p13 = scmp.lt.s32.totalorder %s559_s18, %s552_s17 }
  0x3e   : > { %p555_p7 = pnand %p553_p3, %p509_p5 }
  0x3f   : > { %p562_p6 = por %p561_p13, %p560_p8 }
  0x40   : > { %p556_p4 = pneg %p555_p7 }
  0x42   : > { %p563_p12 = pnand %p562_p6, %p556_p4 }
  0x44   : > { %566 = shalt.err (!%p563_p12)
}
  0x45   : > { %s680_s20 = smov 64   ;;  %s681_s22 = smov 4  }
  0x46   : > { %423 = dma.hbm_to_vmem [thread:$0]  (!%p775_p2), %s911_s1, 128, %s180_s3, [#allocation6], %s680_s20, %s680_s20, %s681_s22  }
  0x47   : > { %p921_p0 = scmp.ne.s32.totalorder %s920_s27, 0 }
  0x48   : > { %s193_s4 = sand.u32 (!%p921_p0), 1, %s662_s13   ;;  %p922_p5 = scmp.ne.s32.totalorder (!%p921_p0), %s916_s21, 0 }
  0x49   : > { %191 = sbr.rel (%p921_p0) target bundleno = 124 (0x7c), region = 28  ;;  %s399_s5 = sshll.u32 (!%p921_p0), %s193_s4, 4 }
  0x4a   : > { %s194_s6 = scalar_lea.sflag (!%p921_p0), [#allocation3], %s193_s4  ;;  %s197_s7 = scalar_lea.vmem (!%p921_p0), [#allocation2], %s399_s5 }
  0x50   : > { %632 = dma.done.wait (%p922_p5), %s194_s6, 256  }
  0x51   : > { %634 = vsyncadd (%p922_p5), %s194_s6, 4294967040  ;;  %s400_s29 = sshll.u32 %s193_s4, 3  ;;  %s203_s8 = scalar_lea.sflag [#allocation6], %s193_s4 }
  0x52   : > { %s206_s28 = scalar_lea.vmem [#allocation5], %s400_s29 }
  0x53   : > { %636 = dma.done.wait (%p922_p5), %s203_s8, 128  }
  0x54   : > { %638 = vsyncadd (%p922_p5), %s203_s8, 4294967168  ;;  %s229_s27 = sand.u32 1, %s650_s10   ;;  %v258_v0 = vlaneseq  ;;  %v682_v1 = vmov 0.0   ;;  %s401_s12 = sshll.u32 %s666_s14, 4  ;;  %v408_v5 = vld [vmem:[%s206_s28] sm:$0xff]   ;;  %v245_v13 = vld [vmem:[%s197_s7 + $0x8] sm:$0xff] }
  0x55   : > { %s841_s3 = scalar_lea.vmem [#allocation7], %s229_s27  ;;  %v261_v4 = vstv %s401_s12  ;;  %v409_v6 = vunpack.c.l.bf16 %v408_v5  ;;  %v410_v7 = vunpack.c.h.bf16 %v408_v5  ;;  %v244_v12 = vld [vmem:[%s197_s7] sm:$0xff]  ;;  %s854_s20 = scalar_lea.hbm %s912_s2, %s401_s12 }
  0x56   : > { %243 = vst [vmem:[%s841_s3] sm:$0x1] %v682_v1  ;;  %v259_v2 = vshrl.u32 %v258_v0, 7  ;;  %s291_s21 = sshll.u32 %s841_s3, 4  ;;  %s279_s22 = scalar_lea.sflag [#allocation4], %s229_s27  ;;  %s856_s21 = int_to_ptr.vmem [resolvable:$true] %s291_s21 }
  0x57   : > { %v250_v10 = vmul.f32 2.0, %v409_v6  ;;  %v251_v11 = vmul.f32 2.0, %v410_v7  ;;  %s567_s23 = scalar_lea.vmem %s856_s21, 16  ;;  %p923_p13 = scmp.ne.s32.totalorder %s917_s25, 0 }
  0x58   : > { %v260_v3 = vadd.s32 8, %v259_v2  ;;  %v262_v8 = vadd.s32 %v261_v4, %v259_v2  ;;  %p568_p2 = scmp.ne.s32.totalorder %s856_s21, %s567_s23  ;;  %s683_s30 = smov [#allocation7]  }
  0x59   : > { %v252_v14 = vsub.f32 1.0, %v250_v10  ;;  %v253_v15 = vsub.f32 1.0, %v251_v11  ;;  %s571_s14 = sshll.u32 %s683_s30, 4  ;;  %s572_s14 = int_to_ptr.vmem [resolvable:$false] %s571_s14 }
  0x5a   : > { %v263_v9 = vadd.s32 %v261_v4, %v260_v3  ;;  %vm264_vm0 = vcmp.lt.s32.totalorder %v262_v8, 16  ;;  %p569_p9 = pnand %p568_p2, %p923_p13  ;;  %s573_s4 = scalar_lea.vmem %s572_s14, 32 }
  0x5b   : > { %v254_v16 = vmul.f32 %v252_v14, %v244_v12  ;;  %v255_v17 = vmul.f32 %v253_v15, %v245_v13  ;;  %p574_p11 = scmp.lt.s32.totalorder %s856_s21, %s572_s14  ;;  %p575_p1 = scmp.lt.s32.totalorder %s573_s4, %s567_s23 }
  0x5c   : > { %vm265_vm1 = vcmp.lt.s32.totalorder %v263_v9, 16  ;;  %p570_p10 = pneg %p569_p9 }
  0x5d   : > { %v266_v18 = vsel %vm264_vm0, %v254_v16, 0.0  ;;  %v267_v19 = vsel %vm265_vm1, %v255_v17, 0.0  ;;  %v275_v26 = vld [vmem:[%s841_s3] sm:$0x1]  ;;  %p576_p3 = por %p575_p1, %p574_p11 }
  0x5e   : > { %v268_v20 = vadd.f32 %v267_v19, %v266_v18 }
  0x5f   : > { %p577_p7 = pnand %p576_p3, %p570_p10 }
  0x60   : > { %v269_v21 = vrot.slane %v268_v20, 4 }
  0x62   : > { %v270_v22 = vadd.f32 %v269_v21, %v268_v20 }
  0x64   : > { %v271_v23 = vrot.slane %v270_v22, 2 }
  0x66   : > { %v272_v24 = vadd.f32 %v271_v23, %v270_v22 }
  0x68   : > { %v273_v25 = vrot.slane %v272_v24, 1 }
  0x6a   : > { %v274_v27 = vadd.f32 %v273_v25, %v272_v24 }
  0x6c   : > { %v276_v28 = vadd.f32 %v275_v26, %v274_v27 }
  0x6e   : > { %277 = vst [vmem:[%s841_s3] sm:$0x1] %v276_v28 }
  0x6f   : > { %580 = shalt.err (!%p577_p7)
}
  0x70   : > { %s581_s5 = scalar_lea.hbm %s854_s20, 16  ;;  %s585_s29 = scalar_lea.hbm %s912_s2, 32 }
  0x71   : > { %p582_p4 = scmp.ne.s32.totalorder %s854_s20, %s581_s5  ;;  %p586_p12 = scmp.lt.u32.totalorder %s854_s20, %s912_s2 }
  0x72   : > { %p587_p0 = scmp.lt.u32.totalorder %s585_s29, %s581_s5  ;;  %p589_p2 = scmp.lt.u32.totalorder %s581_s5, %s854_s20 }
  0x73   : > { %p583_p8 = pnand %p582_p4, %p923_p13 }
  0x74   : > { %p588_p5 = por %p587_p0, %p586_p12 }
  0x75   : > { %p584_p6 = pneg %p583_p8 }
  0x76   : > { %p590_p9 = por %p589_p2, %p588_p5 }
  0x78   : > { %p591_p10 = pnand %p590_p9, %p584_p6 }
  0x7a   : > { %594 = shalt.err (!%p591_p10)
}
  0x7b   : > { %415 = dma.vmem_to_hbm [thread:$0]  (%p923_p13), %s856_s21, 16, %s854_s20, %s279_s22  }
  0x7c PF: > { %s303_s27 = sand.u32 1, %s646_s9   ;;  %p924_p11 = scmp.ne.s32.totalorder %s918_s26, 0 }
  0x7d   : > { %p925_p1 = scmp.ge.s32.totalorder %s674_s16, 2  ;;  %s304_s3 = scalar_lea.sflag [#allocation4], %s303_s27 }
  0x7f   : > { %p425_p3 = pnand %p925_p1, %p924_p11 }
  0x81   : > { %640 = dma.done.wait (!%p425_p3), %s304_s3, 16  }
  0x82   : > { %642 = vsyncadd (!%p425_p3), %s304_s3, 4294967280  ;;  %s21_s16 = sadd.s32 1, %s674_s16   ;;  %s926_s9 = smov %s650_s10 }
  0x83   : > { %p18_p7 = scmp.ge.s32.totalorder %s21_s16, 4   ;;  %s927_s10 = smov %s654_s11 }
  0x84   : > { %s928_s11 = smov %s757_s24  ;;  %s929_s12 = smov %s662_s13 }
  0x85   : > { %s900_s13 = smov 0   ;;  %s930_s14 = smov %s670_s15 }
  0x86   : > { %s931_s15 = smov %s933_s19  ;;  %20 = sbr.rel (!%p18_p7) target bundleno = 9 (0x9), region = 90 }
  0x8d   :  { %308 = vsyncpa [#allocation3], 1 }
  0x8e   :  { %310 = vsyncpa [#allocation3 + $0x1], 1 }
  0x8f   :  { %311 = vsyncpa [#allocation6], 1 }
  0x90   :  { %313 = vsyncpa [#allocation6 + $0x1], 1 }
  0x91   :  { %314 = vsyncpa [#allocation4], 1 }
  0x92   :  { %316 = vsyncpa [#allocation4 + $0x1], 1 }

</bundles_post_ra>
